<compile_context>
chip_gen: v5e
topology: v5e:2x2
jax: 0.10.0
libtpu: 0.0.40
codegen_flags: <defaults>
</compile_context>

<pallas_src>
import functools

import jax
import jax.numpy as jnp
from jax import lax
from jax.experimental import pallas as pl
from jax.experimental.pallas import tpu as pltpu

LANES = 128


def _auto_num_splits():
    """2 grid-splits only on parts with 2 TensorCores per chip (v7x-class)."""
    try:
        kind = jax.devices()[0].device_kind.lower()
    except Exception:
        return 1
    return 2 if ("v7" in kind or "tpu7" in kind) else 1


def _qfocal_kernel(pred_ref, true_ref, out_ref, *, gamma, alpha,
                   blocks_per_split, rows, last_full, needs_mask,
                   approx_recip):
    c = pl.program_id(0)
    i = pl.program_id(1)

    # Output block index depends only on the split axis, so it stays resident
    # in VMEM across the reduction axis: init once, accumulate.
    @pl.when(i == 0)
    def _():
        out_ref[...] = jnp.zeros_like(out_ref)

    x = pred_ref[...].astype(jnp.float32)
    t = true_ref[...].astype(jnp.float32)

    # Numerically stable BCE-with-logits, sharing e = exp(-|x|) with sigmoid:
    #   bce = max(x, 0) - x*t + log(1 + exp(-|x|))
    e = jnp.exp(-jnp.abs(x))
    bce = jnp.maximum(x, 0.0) - x * t + jnp.log1p(e)

    one_plus_e = 1.0 + e
    if approx_recip:
        inv = pl.reciprocal(one_plus_e, approx=True)   # EUP, no refinement
    else:
        inv = 1.0 / one_plus_e
    p = jnp.where(x >= 0.0, inv, e * inv)              # sigmoid(x)

    # alpha_factor = t*a + (1-t)*(1-a)  ==  (1-a) + t*(2a-1)   (constants folded)
    alpha_factor = (1.0 - alpha) + t * (2.0 * alpha - 1.0)
    d = jnp.abs(t - p)
    if gamma == 1.5:            # default: avoid general pow (exp + log on EUP)
        mod = d * jnp.sqrt(d)
    elif gamma == 2.0:
        mod = d * d
    elif gamma == 1.0:
        mod = d
    else:
        mod = d ** gamma
    loss = bce * alpha_factor * mod

    def accumulate(v):
        # Sublane-group partial sum: (tile_rows,128) -> (8,128), pure VPU adds.
        out_ref[...] += jnp.sum(v.reshape(-1, 8, LANES), axis=0)

    if needs_mask:
        tile_rows = pred_ref.shape[0]
        block = c * blocks_per_split + i

        @pl.when(block < last_full)          # fully-valid tiles: no mask cost
        def _():
            accumulate(loss)

        @pl.when(block >= last_full)         # partial / overhang tile(s) only
        def _():
            row0 = block * tile_rows
            grow = lax.broadcasted_iota(jnp.int32, (tile_rows, LANES), 0) + row0
            # jnp.where is a per-element select, so garbage (possibly NaN) in
            # the out-of-bounds overhang cannot poison the accumulator.
            accumulate(jnp.where(grow < rows, loss, 0.0))
    else:
        accumulate(loss)


def _qfocal_xla(pred, true, gamma, alpha, reduction):
    """Pure-JAX fast path for tiny inputs (pallas_call overhead dominates)."""
    x = pred.astype(jnp.float32)
    t = true.astype(jnp.float32)
    bce = jnp.maximum(x, 0.0) - x * t + jnp.log1p(jnp.exp(-jnp.abs(x)))
    p = jax.nn.sigmoid(x)
    loss = bce * ((1.0 - alpha) + t * (2.0 * alpha - 1.0)) * jnp.abs(t - p) ** gamma
    if reduction == "mean":
        return jnp.mean(loss)
    elif reduction == "sum":
        return jnp.sum(loss)
    raise NotImplementedError("reduction='none' is not supported")


def qfocal_loss(pred, true, gamma=1.5, alpha=0.25, reduction="mean",
                tile_rows=4096, num_splits=None, approx_recip=False,
                min_pallas_elements=0):
    """QFocalLoss(nn.BCEWithLogitsLoss())(pred, true) -> scalar loss."""
    assert pred.shape == true.shape
    n_valid = int(pred.size)
    assert n_valid > 0

    if n_valid < min_pallas_elements:
        # Opt-in small-input fallback (production: ~1<<18); disabled by default
        # so the Pallas kernel always runs in this script.
        return _qfocal_xla(pred, true, float(gamma), float(alpha), reduction)

    rows = pl.cdiv(n_valid, LANES)
    rows_padded = max(rows, 16)                 # tiny inputs: pad to 16 rows
    padded = rows_padded * LANES

    # Tile rows: multiple of 16 (bf16 sublane packing), clamped to the slab.
    t_req = max(16, (int(tile_rows) // 16) * 16)
    tile_rows = min(t_req, (rows_padded // 16) * 16)
    nblocks = pl.cdiv(rows_padded, tile_rows)

    if num_splits is None:
        num_splits = _auto_num_splits()
    num_splits = max(1, min(int(num_splits), nblocks))
    blocks_per_split = pl.cdiv(nblocks, num_splits)
    covered_rows = num_splits * blocks_per_split * tile_rows
    needs_mask = covered_rows != rows_padded
    last_full = rows_padded // tile_rows        # blocks [0, last_full) are full

    def to_slab(a, pad_value):
        a = jnp.ravel(a)
        if padded != n_valid:
            # <= 127 extra elements (plus up-to-16-rows only for tiny inputs).
            # pred padded with a huge negative logit, true with 0 -> padded
            # elements give exactly-zero loss, so no in-kernel mask is needed
            # for them.  128-aligned inputs skip this entirely (free reshape).
            a = jnp.pad(a, (0, padded - n_valid), constant_values=pad_value)
        return a.reshape(rows_padded, LANES)

    pred2d = to_slab(pred, -1e4)
    true2d = to_slab(true, 0.0)

    kernel = functools.partial(
        _qfocal_kernel, gamma=float(gamma), alpha=float(alpha),
        blocks_per_split=blocks_per_split, rows=rows_padded,
        last_full=last_full, needs_mask=needs_mask,
        approx_recip=bool(approx_recip))

    if num_splits * blocks_per_split == nblocks:
        def in_map(c, i):
            return (c * blocks_per_split + i, 0)
    else:
        def in_map(c, i):
            # Overhang blocks (entirely past the array) are clamped onto the
            # last real block; the in-kernel mask zeroes their contribution.
            return (jnp.minimum(c * blocks_per_split + i, nblocks - 1), 0)

    bytes_in = n_valid * (jnp.dtype(pred.dtype).itemsize +
                          jnp.dtype(true.dtype).itemsize)
    cost = pl.CostEstimate(flops=20 * n_valid,
                           transcendentals=3 * n_valid,
                           bytes_accessed=bytes_in + num_splits * 8 * LANES * 4)

    partials = pl.pallas_call(
        kernel,
        out_shape=jax.ShapeDtypeStruct((num_splits * 8, LANES), jnp.float32),
        grid_spec=pltpu.PrefetchScalarGridSpec(
            num_scalar_prefetch=0,
            grid=(num_splits, blocks_per_split),
            in_specs=[
                pl.BlockSpec((tile_rows, LANES), in_map),
                pl.BlockSpec((tile_rows, LANES), in_map),
            ],
            out_specs=pl.BlockSpec((8, LANES), lambda c, i: (c, 0)),
        ),
        compiler_params=pltpu.CompilerParams(
            dimension_semantics=("parallel", "arbitrary")),
        cost_estimate=cost,
    )(pred2d, true2d)

    total = jnp.sum(partials)
    if reduction == "mean":       # nn.BCEWithLogitsLoss default
        return total / jnp.float32(n_valid)
    elif reduction == "sum":
        return total
    else:
        # TODO(synk): reduction='none' (full elementwise map output) not
        # implemented; YOLOv5 always uses the default 'mean'.
        raise NotImplementedError("reduction='none' is not supported")


def _reference(pred, true, gamma=1.5, alpha=0.25):
    x = pred.astype(jnp.float32)
    t = true.astype(jnp.float32)
    bce = jnp.maximum(x, 0.0) - x * t + jnp.log1p(jnp.exp(-jnp.abs(x)))
    p = jax.nn.sigmoid(x)
    loss = bce * (t * alpha + (1 - t) * (1 - alpha)) * jnp.abs(t - p) ** gamma
    return jnp.mean(loss)


if __name__ == "__main__":
    key = jax.random.PRNGKey(0)
    k1, k2, k3, k4 = jax.random.split(key, 4)

    # 1) Typical YOLOv5-style small aligned case: single block, no masking.
    pred = jax.random.normal(k1, (2, 4, 16, 16), dtype=jnp.float32)
    true = (jax.random.uniform(k2, (2, 4, 16, 16)) > 0.8).astype(jnp.float32)
    out = jax.block_until_ready(qfocal_loss(pred, true))
    ref = _reference(pred, true)
    assert jnp.allclose(out, ref, rtol=1e-4, atol=1e-6), ("case1", out, ref)

    # 2) Unaligned size: exercises the <=127-element pad, the partial-block
    #    in-kernel mask, and the explicit 2-way split (serial on 1-TC chips).
    pred2 = jax.random.normal(k3, (3, 5, 21, 17), dtype=jnp.float32)
    true2 = (jax.random.uniform(k4, (3, 5, 21, 17)) > 0.7).astype(jnp.float32)
    out2 = jax.block_until_ready(qfocal_loss(pred2, true2, num_splits=2))
    ref2 = _reference(pred2, true2)
    assert jnp.allclose(out2, ref2, rtol=1e-4, atol=1e-6), ("case2", out2, ref2)

    # 3) Approximate-reciprocal (EUP) path — looser tolerance.
    out3 = jax.block_until_ready(
        qfocal_loss(pred2, true2, num_splits=2, approx_recip=True))
    assert jnp.allclose(out3, ref2, rtol=5e-3, atol=1e-5), ("case3", out3, ref2)

    # 4) bf16 inputs: half the HBM traffic, per-tile f32 math inside.
    p_bf, t_bf = pred.astype(jnp.bfloat16), true.astype(jnp.bfloat16)
    out4 = jax.block_until_ready(qfocal_loss(p_bf, t_bf))
    ref4 = _reference(p_bf, t_bf)
    assert jnp.allclose(out4, ref4, rtol=1e-3, atol=1e-6), ("case4", out4, ref4)

    print("KERNEL_OK")
</pallas_src>

<mosaic_0001>
module attributes {stable_mosaic.version = 11 : i64} {
  func.func @_qfocal_kernel(%arg0: i32, %arg1: i32, %arg2: memref<16x128xf32, #tpu.memory_space<vmem>>, %arg3: memref<16x128xf32, #tpu.memory_space<vmem>>, %arg4: memref<8x128xf32, #tpu.memory_space<vmem>>) attributes {dimension_semantics = [#tpu.dimension_semantics<parallel>, #tpu.dimension_semantics<arbitrary>], iteration_bounds = array<i64: 1, 1>, scalar_prefetch = 0 : i64, scratch_operands = 0 : i64, tpu.core_type = #tpu.core_type<tc>, window_params = [{transform_indices = @transform_0, window_bounds = array<i64: 16, 128>}, {transform_indices = @transform_1, window_bounds = array<i64: 16, 128>}, {transform_indices = @transform_2, window_bounds = array<i64: 8, 128>}]} {
    %c0_i32 = arith.constant 0 : i32
    %0 = arith.cmpi eq, %arg1, %c0_i32 : i32
    %1 = arith.extui %0 : i1 to i32
    %c0_i32_0 = arith.constant 0 : i32
    %2 = arith.cmpi ne, %1, %c0_i32_0 : i32
    scf.if %2 {
      %cst_15 = arith.constant 0.000000e+00 : f32
      %38 = vector.broadcast %cst_15 : f32 to vector<8x128xf32>
      %c0_16 = arith.constant 0 : index
      %c0_17 = arith.constant 0 : index
      %39 = vector.load %arg4[%c0_16, %c0_17] : memref<8x128xf32, #tpu.memory_space<vmem>>, vector<8x128xf32>
      tpu.vector_store %arg4[%c0_16, %c0_17], %38 {strides = array<i32>} : memref<8x128xf32, #tpu.memory_space<vmem>>, vector<8x128xf32>,
    } else {
    }
    %c0 = arith.constant 0 : index
    %c0_1 = arith.constant 0 : index
    %3 = vector.load %arg2[%c0, %c0_1] : memref<16x128xf32, #tpu.memory_space<vmem>>, vector<16x128xf32>
    %c0_2 = arith.constant 0 : index
    %c0_3 = arith.constant 0 : index
    %4 = vector.load %arg3[%c0_2, %c0_3] : memref<16x128xf32, #tpu.memory_space<vmem>>, vector<16x128xf32>
    %5 = math.absf %3 : vector<16x128xf32>
    %cst = arith.constant 0.000000e+00 : f32
    %6 = vector.broadcast %cst : f32 to vector<16x128xf32>
    %7 = arith.subf %6, %5 : vector<16x128xf32>
    %8 = math.exp %7 : vector<16x128xf32>
    %cst_4 = arith.constant 0.000000e+00 : f32
    %9 = vector.broadcast %cst_4 : f32 to vector<16x128xf32>
    %10 = arith.maximumf %3, %9 : vector<16x128xf32>
    %11 = arith.mulf %3, %4 : vector<16x128xf32>
    %12 = arith.subf %10, %11 : vector<16x128xf32>
    %13 = math.log1p %8 : vector<16x128xf32>
    %14 = arith.addf %12, %13 : vector<16x128xf32>
    %cst_5 = arith.constant 1.000000e+00 : f32
    %15 = vector.broadcast %cst_5 : f32 to vector<16x128xf32>
    %16 = arith.addf %15, %8 : vector<16x128xf32>
    %cst_6 = arith.constant 1.000000e+00 : f32
    %17 = vector.broadcast %cst_6 : f32 to vector<16x128xf32>
    %18 = arith.divf %17, %16 : vector<16x128xf32>
    %cst_7 = arith.constant 0.000000e+00 : f32
    %19 = vector.broadcast %cst_7 : f32 to vector<16x128xf32>
    %20 = arith.cmpf oge, %3, %19 : vector<16x128xf32>
    %21 = arith.mulf %8, %18 : vector<16x128xf32>
    %22 = arith.select %20, %18, %21 : vector<16x128xi1>, vector<16x128xf32>
    %cst_8 = arith.constant -5.000000e-01 : f32
    %23 = vector.broadcast %cst_8 : f32 to vector<16x128xf32>
    %24 = arith.mulf %4, %23 : vector<16x128xf32>
    %cst_9 = arith.constant 7.500000e-01 : f32
    %25 = vector.broadcast %cst_9 : f32 to vector<16x128xf32>
    %26 = arith.addf %25, %24 : vector<16x128xf32>
    %27 = arith.subf %4, %22 : vector<16x128xf32>
    %28 = math.absf %27 : vector<16x128xf32>
    %29 = math.sqrt %28 : vector<16x128xf32>
    %30 = arith.mulf %28, %29 : vector<16x128xf32>
    %31 = arith.mulf %14, %26 : vector<16x128xf32>
    %32 = arith.mulf %31, %30 : vector<16x128xf32>
    %c0_10 = arith.constant 0 : index
    %c0_11 = arith.constant 0 : index
    %33 = vector.load %arg4[%c0_10, %c0_11] : memref<8x128xf32, #tpu.memory_space<vmem>>, vector<8x128xf32>
    %34 = vector.shape_cast %32 : vector<16x128xf32> to vector<2x8x128xf32>
    %cst_12 = arith.constant dense<0.000000e+00> : vector<8x128xf32>
    %35 = vector.multi_reduction <add>, %34, %cst_12 [0] : vector<2x8x128xf32> to vector<8x128xf32>
    %36 = arith.addf %33, %35 : vector<8x128xf32>
    %c0_13 = arith.constant 0 : index
    %c0_14 = arith.constant 0 : index
    %37 = vector.load %arg4[%c0_13, %c0_14] : memref<8x128xf32, #tpu.memory_space<vmem>>, vector<8x128xf32>
    tpu.vector_store %arg4[%c0_13, %c0_14], %36 {strides = array<i32>} : memref<8x128xf32, #tpu.memory_space<vmem>>, vector<8x128xf32>,
    return
  }
  func.func @transform_0(%arg0: i32, %arg1: i32) -> (i32, i32) {
    %c1_i32 = arith.constant 1 : i32
    %0 = arith.muli %arg0, %c1_i32 : i32
    %1 = arith.addi %0, %arg1 : i32
    %c0_i32 = arith.constant 0 : i32
    %c0_i32_0 = arith.constant 0 : i32
    return %1, %c0_i32 : i32, i32
  }
  func.func @transform_1(%arg0: i32, %arg1: i32) -> (i32, i32) {
    %c1_i32 = arith.constant 1 : i32
    %0 = arith.muli %arg0, %c1_i32 : i32
    %1 = arith.addi %0, %arg1 : i32
    %c0_i32 = arith.constant 0 : i32
    %c0_i32_0 = arith.constant 0 : i32
    return %1, %c0_i32 : i32, i32
  }
  func.func @transform_2(%arg0: i32, %arg1: i32) -> (i32, i32) {
    %c0_i32 = arith.constant 0 : i32
    %c0_i32_0 = arith.constant 0 : i32
    return %arg0, %c0_i32 : i32, i32
  }
}

</mosaic_0001>

<bundles_post_ra>
// kernel: tpu_custom_call.1
= control target key start
LH: loop header
LB: loop body
LE: loop exit
PB: predicated region body
PF: predicated region fallthrough
CT: control target
= control target key end

     0   :  { %7 = vsyncpa [#allocation3], 0  ;;  %s364_s0 = inlined_call_operand.hbm [shape: f32[16,128], index: 0, kind: input, shape index: {}]   ;;  %s365_s1 = inlined_call_operand.hbm [shape: f32[16,128], index: 1, kind: input, shape index: {}]   ;;  %s366_s2 = inlined_call_operand.hbm [shape: f32[8,128], index: 2, kind: output, shape index: {}]  }
   0x1   :  { %8 = vsyncpa [#allocation6], 0 }
   0x2   :  { %9 = vsyncpa [#allocation4], 0  ;;  %s18_s11 = sshll.u32 %s364_s0, 4  ;;  %s297_s12 = smov [#allocation2]   ;;  %s19_s11 = int_to_ptr.hbm [resolvable:$true] %s18_s11 }
   0x3   :  { %s20_s13 = sshll.u32 %s297_s12, 4  ;;  %s35_s16 = sshll.u32 %s365_s1, 4  ;;  %s21_s13 = int_to_ptr.vmem [resolvable:$true] %s20_s13  ;;  %s36_s16 = int_to_ptr.hbm [resolvable:$true] %s35_s16 }
   0x4   :  { %s298_s17 = smov 128   ;;  %s299_s18 = smov 8  }
   0x5   :  { %26 = dma.hbm_to_vmem [thread:$0]  %s19_s11, 256, %s21_s13, [#allocation3], %s298_s17, %s298_s17, %s299_s18  }
   0x6   :  { %s300_s19 = smov [#allocation5]  }
   0x7   :  { %s37_s20 = sshll.u32 %s300_s19, 4  ;;  %s38_s20 = int_to_ptr.vmem [resolvable:$true] %s37_s20 }
   0x8   :  { %43 = dma.hbm_to_vmem [thread:$0]  %s36_s16, 256, %s38_s20, [#allocation6], %s298_s17, %s298_s17, %s299_s18  }
   0x9   :  { %291 = dma.done.wait [#allocation3], 256  }
   0xa   :  { %292 = vsyncadd [#allocation3], 4294967040 }
   0xb   :  { %293 = dma.done.wait [#allocation6], 256  }
   0xc   :  { %294 = vsyncadd [#allocation6], 4294967040  ;;  %v323_v0 = vld [vmem:[#allocation2] sm:$0xff]  ;;  %v325_v1 = vld [vmem:[#allocation2 + $0x8] sm:$0xff]  ;;  %s301_s0 = smov [#allocation7]   ;;  %s186_s23 = sshll.u32 %s366_s2, 4  ;;  %s187_s23 = int_to_ptr.hbm [resolvable:$true] %s186_s23 }
   0xd   :  { %v65_v2 = vand.u32 2147483647, %v323_v0  ;;  %v66_v3 = vand.u32 2147483647, %v325_v1  ;;  %vm131_vm8 = vcmp.ge.f32.partialorder %v323_v0, 0.0  ;;  %v63_v31 = vld [vmem:[#allocation5] sm:$0xff] }
   0xe   :  { %vm132_vm9 = vcmp.ge.f32.partialorder %v325_v1, 0.0  ;;  %v64_v34 = vld [vmem:[#allocation5 + $0x8] sm:$0xff]  ;;  %v73_v52 = vmax.f32 %v323_v0, 0.0  ;;  %v74_v53 = vmax.f32 %v325_v1, 0.0  ;;  %v75_v54 = vmul.f32 %v63_v31, %v323_v0  ;;  %s184_s1 = sshll.u32 %s301_s0, 4  ;;  %s185_s1 = int_to_ptr.vmem [resolvable:$true] %s184_s1 }
   0xf   :  { %v67_v4 = vsub.f32 0.0, %v65_v2  ;;  %v68_v5 = vsub.f32 0.0, %v66_v3  ;;  %v76_v56 = vmul.f32 %v64_v34, %v325_v1  ;;  %v138_v1 = vmul.f32 -0.5, %v64_v34 }
  0x10   :  { %v77_v3 = vsub.f32 %v73_v52, %v75_v54 }
  0x11   :  { %v69_v6 = vmul.f32 1.442695, %v67_v4  ;;  %v71_v7 = vmul.f32 1.442695, %v68_v5  ;;  %v137_v4 = vmul.f32 -0.5, %v63_v31 }
  0x13   :  { %203 = vpow2.f32 %v69_v6  ;;  %v78_v6 = vsub.f32 %v74_v53, %v76_v56 }
  0x14   :  { %205 = vpow2.f32 %v71_v7 }
  0x19   :  { %v329_v8 = vpop.eup %203 }
  0x1a   :  { %v331_v9 = vpop.eup %205  ;;  %v79_v10 = vadd.f32 1.0, %v329_v8  ;;  %v82_v42 = vmul.f32 -0.5, %v329_v8  ;;  %v85_v47 = vand.u32 2147483647, %v329_v8 }
  0x1b   :  { %v88_v11 = vadd.f32 1.0, %v331_v9  ;;  %v91_v43 = vmul.f32 -0.5, %v331_v9  ;;  %v94_v50 = vand.u32 2147483647, %v331_v9 }
  0x1c   :  { %207 = vrcp.f32 %v79_v10  ;;  %vm106_vm0 = vweird.f32 %v79_v10  ;;  %v112_v15 = vand.u32 2147483648, %v79_v10  ;;  %v110_v18 = vand.u32 2147483647, %v79_v10 }
  0x1d   :  { %209 = vrcp.f32 %v88_v11  ;;  %v127_v19 = vand.u32 2147483648, %v88_v11  ;;  %vm121_vm2 = vweird.f32 %v88_v11  ;;  %v125_v21 = vand.u32 2147483647, %v88_v11 }
  0x1e   :  { %v113_v23 = vor.u32 1.1754944e-38, %v112_v15  ;;  %vm111_vm5 = vcmp.eq.f32.partialorder %v110_v18, 8.507059e+37  ;;  %211 = vlog2.f32 %v79_v10  ;;  %v83_v45 = vadd.f32 1.0, %v82_v42 }
  0x1f   :  { %v128_v26 = vor.u32 1.1754944e-38, %v127_v19  ;;  %vm126_vm7 = vcmp.eq.f32.partialorder %v125_v21, 8.507059e+37  ;;  %213 = vlog2.f32 %v88_v11  ;;  %v92_v48 = vadd.f32 1.0, %v91_v43 }
  0x20   :  { %v84_v58 = vmul.f32 %v329_v8, %v83_v45  ;;  %vm348_vm10 = vcmp.lt.f32.partialorder %v85_v47, 0.0004427343  ;;  %vm353_vm11 = vcmp.lt.f32.partialorder %v94_v50, 0.0004427343 }
  0x21   :  { %v93_v62 = vmul.f32 %v331_v9, %v92_v48 }
  0x22   :  { %v208_v12 = vpop.eup %207 }
  0x23   :  { %v210_v13 = vpop.eup %209  ;;  %v102_v14 = vmul.f32 %v208_v12, %v79_v10  ;;  %vm107_vm1 = vweird.f32 %v208_v12 }
  0x24   :  { %v117_v16 = vmul.f32 %v210_v13, %v88_v11  ;;  %vm122_vm3 = vweird.f32 %v210_v13  ;;  %vm108_vm4 = vmor %vm106_vm0, %vm107_vm1  ;;  %v212_v44 = vpop.eup %211 }
  0x25   :  { %v103_v17 = vsub.f32 1.0, %v102_v14  ;;  %vm123_vm6 = vmor %vm121_vm2, %vm122_vm3  ;;  %v214_v46 = vpop.eup %213  ;;  %v81_v57 = vmul.f32 0.6931472, %v212_v44  ;;  %v140_v14 = vadd.f32 0.75, %v138_v1 }
  0x26   :  { %v118_v20 = vsub.f32 1.0, %v117_v16  ;;  %v90_v61 = vmul.f32 0.6931472, %v214_v46 }
  0x27   :  { %v104_v22 = vmul.f32 %v208_v12, %v103_v17  ;;  %v87_v7 = vsel %vm348_vm10, %v84_v58, %v81_v57 }
  0x28   :  { %v119_v24 = vmul.f32 %v210_v13, %v118_v20  ;;  %v96_v10 = vsel %vm353_vm11, %v93_v62, %v90_v61 }
  0x29   :  { %v105_v25 = vadd.f32 %v208_v12, %v104_v22  ;;  %v98_v16 = vadd.f32 %v96_v10, %v78_v6 }
  0x2a   :  { %v120_v27 = vadd.f32 %v210_v13, %v119_v24 }
  0x2b   :  { %v109_v28 = vsel %vm108_vm4, %v208_v12, %v105_v25  ;;  %v97_v12 = vadd.f32 %v87_v7, %v77_v3 }
  0x2c   :  { %v114_v29 = vsel %vm111_vm5, %v113_v23, %v109_v28  ;;  %v124_v30 = vsel %vm123_vm6, %v210_v13, %v120_v27  ;;  %v139_v13 = vadd.f32 0.75, %v137_v4 }
  0x2d   :  { %v129_v32 = vsel %vm126_vm7, %v128_v26, %v124_v30  ;;  %v133_v33 = vmul.f32 %v329_v8, %v114_v29  ;;  %v172_v26 = vmul.f32 %v140_v14, %v98_v16 }
  0x2e   :  { %v134_v35 = vmul.f32 %v331_v9, %v129_v32  ;;  %v171_v23 = vmul.f32 %v139_v13, %v97_v12 }
  0x2f   :  { %v135_v36 = vsel %vm131_vm8, %v114_v29, %v133_v33 }
  0x30   :  { %v136_v37 = vsel %vm132_vm9, %v129_v32, %v134_v35  ;;  %v141_v38 = vsub.f32 %v63_v31, %v135_v36 }
  0x31   :  { %v142_v39 = vsub.f32 %v64_v34, %v136_v37 }
  0x32   :  { %v143_v40 = vand.u32 2147483647, %v141_v38 }
  0x33   :  { %v144_v41 = vand.u32 2147483647, %v142_v39 }
  0x34   :  { %215 = vrsqrt.f32 %v143_v40  ;;  %vm152_vm12 = vcmp.eq.f32.partialorder %v143_v40, inf  ;;  %v155_v17 = vand.u32 2147483648, %v143_v40  ;;  %vm154_vm13 = vcmp.eq.f32.partialorder %v143_v40, 0.0 }
  0x35   :  { %217 = vrsqrt.f32 %v144_v41  ;;  %vm164_vm14 = vcmp.eq.f32.partialorder %v144_v41, inf  ;;  %v167_v20 = vand.u32 2147483648, %v144_v41  ;;  %vm166_vm15 = vcmp.eq.f32.partialorder %v144_v41, 0.0 }
  0x3a   :  { %v216_v49 = vpop.eup %215 }
  0x3b   :  { %v218_v51 = vpop.eup %217  ;;  %v146_v55 = vmul.f32 %v216_v49, %v143_v40 }
  0x3c   :  { %v158_v59 = vmul.f32 %v218_v51, %v144_v41 }
  0x3d   :  { %v147_v63 = vmul.f32 %v216_v49, %v146_v55 }
  0x3e   :  { %v159_v0 = vmul.f32 %v218_v51, %v158_v59 }
  0x3f   :  { %v148_v5 = vmul.f32 0.5, %v147_v63 }
  0x40   :  { %v160_v8 = vmul.f32 0.5, %v159_v0 }
  0x41   :  { %v149_v11 = vsub.f32 1.5, %v148_v5 }
  0x42   :  { %v161_v9 = vsub.f32 1.5, %v160_v8 }
  0x43   :  { %v150_v15 = vmul.f32 %v216_v49, %v149_v11 }
  0x44   :  { %v162_v18 = vmul.f32 %v218_v51, %v161_v9 }
  0x45   :  { %v151_v19 = vmul.f32 %v150_v15, %v143_v40 }
  0x46   :  { %v163_v21 = vmul.f32 %v162_v18, %v144_v41 }
  0x47   :  { %v153_v22 = vsel %vm152_vm12, %v143_v40, %v151_v19 }
  0x48   :  { %v156_v24 = vsel %vm154_vm13, %v155_v17, %v153_v22  ;;  %v165_v25 = vsel %vm164_vm14, %v144_v41, %v163_v21 }
  0x49   :  { %v168_v27 = vsel %vm166_vm15, %v167_v20, %v165_v25  ;;  %v169_v28 = vmul.f32 %v156_v24, %v143_v40 }
  0x4a   :  { %v170_v29 = vmul.f32 %v168_v27, %v144_v41 }
  0x4b   :  { %v173_v30 = vmul.f32 %v171_v23, %v169_v28 }
  0x4c   :  { %v174_v31 = vmul.f32 %v172_v26, %v170_v29 }
  0x4e   :  { %v176_v32 = vadd.f32 %v174_v31, %v173_v30 }
  0x50   :  { %178 = vst [vmem:[#allocation7] sm:$0xff] %v176_v32 }
  0x51   :  { %189 = dma.vmem_to_hbm [thread:$0]  %s185_s1, 128, %s187_s23, [#allocation4]  }
  0x52   :  { %295 = dma.done.wait [#allocation4], 128  }
  0x53   :  { %296 = vsyncadd [#allocation4], 4294967168 }
  0x54   :  { %194 = vsyncpa [#allocation3], 1 }
  0x55   :  { %195 = vsyncpa [#allocation6], 1 }
  0x56   :  { %196 = vsyncpa [#allocation4], 1 }

</bundles_post_ra>
